<compile_context>
chip_gen: v6e
topology: v6e:2x2x1
jax: 0.10.0
libtpu: 0.0.40
codegen_flags: <defaults>
</compile_context>

<pallas_src>
import jax
import jax.numpy as jnp
from jax.experimental import pallas as pl
from jax.experimental.pallas import tpu as pltpu

N_BINS = 15
_CHUNK = 512  # lanes processed per inner step of kernel 2 (bounds vreg pressure)


def _round_up(x, m):
    return ((x + m - 1) // m) * m


# --------------------------------------------------------------------------- #
# Kernel 1: fused softmax-max confidence + argmax accuracy, lane-dense over N.
# Logits arrive class-major (C, N): samples on the 128-lane axis, classes on the
# sublane axis, so the class reductions are XLU axis-0 reductions and every VPU op
# is lane-dense.  Partial last blocks need no masking here: invalid lanes compute
# garbage but their writeback is clipped to N by Pallas.
# --------------------------------------------------------------------------- #
def _conf_acc_kernel(logits_ref, labels_ref, out_ref):
    x = logits_ref[...].astype(jnp.float32)                 # (C, T)
    num_classes = x.shape[0]

    m = jnp.max(x, axis=0, keepdims=True)                   # (1, T) max logit
    # First-index argmax (matches torch.max tie behaviour) via iota + min-reduce.
    idx = jax.lax.broadcasted_iota(jnp.int32, x.shape, 0).astype(jnp.float32)
    cand = jnp.where(x == m, idx, jnp.float32(num_classes))
    pred = jnp.min(cand, axis=0, keepdims=True)              # (1, T) f32 class index

    # max softmax prob = exp(m - m) / sum_c exp(x_c - m) = 1 / sum_c exp(x_c - m)
    s = jnp.sum(jnp.exp(x - m), axis=0, keepdims=True)       # (1, T)
    conf = 1.0 / s                                            # exact reciprocal
    corr = (pred == labels_ref[...].astype(jnp.float32)).astype(jnp.float32)

    out_ref[0:1, :] = conf
    out_ref[1:2, :] = corr


# --------------------------------------------------------------------------- #
# Kernel 2: per-bin masked reductions -> scalar ECE, accumulated over N tiles.
# --------------------------------------------------------------------------- #
def _make_ece_kernel(n_valid, tn, chunk):
    inv_n = 1.0 / float(n_valid)
    num_full = tn // chunk
    rem = tn % chunk

    def kernel(cc_ref, edges_ref, ece_ref, cnt_acc, csum_acc, asum_acc):
        i = pl.program_id(0)

        @pl.when(i == 0)
        def _init():
            cnt_acc[...] = jnp.zeros_like(cnt_acc)
            csum_acc[...] = jnp.zeros_like(csum_acc)
            asum_acc[...] = jnp.zeros_like(asum_acc)

        lo = edges_ref[:, 0:1]                                # (n_bins, 1)
        hi = edges_ref[:, 1:2]                                # (n_bins, 1)
        col0 = i * tn

        def accum(start, width):                              # width is a python int
            conf = cc_ref[0:1, pl.ds(start, width)]           # (1, width)
            corr = cc_ref[1:2, pl.ds(start, width)]
            col = col0 + start + jax.lax.broadcasted_iota(jnp.int32, (1, width), 1)
            valid = col < n_valid
            # Sentinel conf = -1 falls outside every (lo, hi] bin (boundaries >= 1/C > 0);
            # corr is zeroed so stale-VMEM NaNs in partial blocks cannot leak into sums.
            conf = jnp.where(valid, conf, -1.0)
            corr = jnp.where(valid, corr, 0.0)
            in_bin = jnp.logical_and(conf > lo, conf <= hi).astype(jnp.float32)  # (n_bins, width)
            cnt_acc[:, :width] += in_bin
            csum_acc[:, :width] += in_bin * conf
            asum_acc[:, :width] += in_bin * corr

        if num_full > 0:
            @pl.loop(0, num_full)
            def _(c):
                accum(pl.multiple_of(c * chunk, chunk), chunk)
        if rem > 0:
            accum(num_full * chunk, rem)

        @pl.when(i == pl.num_programs(0) - 1)
        def _finalize():
            # Single cross-lane reduction at the very end (XLU), then scalar ECE.
            cnt = jnp.sum(cnt_acc[...], axis=1, keepdims=True)     # (n_bins, 1)
            csum = jnp.sum(csum_acc[...], axis=1, keepdims=True)
            asum = jnp.sum(asum_acc[...], axis=1, keepdims=True)
            nonempty = cnt > 0.0
            safe = jnp.where(nonempty, cnt, 1.0)
            gap = jnp.abs(csum / safe - asum / safe)
            contrib = jnp.where(nonempty, gap * (cnt * inv_n), 0.0)
            ece_ref[0, 0] = jnp.sum(contrib)

    return kernel


# --------------------------------------------------------------------------- #
# Wrapper
# --------------------------------------------------------------------------- #
def adaptive_ece(logits, labels, n_bins=N_BINS):
    """Adaptive ECE. logits: (N, C) float (any float dtype), labels: (N,) int.
    Returns shape (1,) float32 (matches the torch module's torch.zeros(1) result)."""
    N, C = logits.shape
    itemsize = jnp.dtype(logits.dtype).itemsize

    # Kernel-1 tile: ~1 MiB of logits per block (amortizes the ~0.35 us/step fixed
    # cost -> HBM-BW-bound).  For small N use one full-extent block (any N allowed).
    tn1 = _round_up(max(128, (1 << 20) // max(1, C * itemsize)), 128)
    if N <= tn1:
        tn1 = N
    grid1 = pl.cdiv(N, tn1)

    # Layout plumbing: class-major view so samples sit on the 128-lane axis.
    # Logits keep their original dtype (cast to f32 inside the kernel).
    # TODO(synk): this transpose is one extra HBM read+write of logits; a class-major
    # producer would remove the last wrapper-side copy.
    logits_t = logits.T                                        # (C, N)
    labels_row = labels.astype(jnp.int32).reshape(1, N)        # (1, N)

    conf_corr = pl.pallas_call(
        _conf_acc_kernel,
        out_shape=jax.ShapeDtypeStruct((2, N), jnp.float32),   # row 0: conf, row 1: corr
        grid=(grid1,),
        in_specs=[pl.BlockSpec((C, tn1), lambda i: (0, i)),
                  pl.BlockSpec((1, tn1), lambda i: (0, i))],
        out_specs=pl.BlockSpec((2, tn1), lambda i: (0, i)),
        compiler_params=pltpu.CompilerParams(
            dimension_semantics=("parallel",)),
    )(logits_t, labels_row)

    # ---- glue: equal-frequency bin edges (histedges_equalN) ----
    # TODO(synk): sort + interp stay in plain JAX (float32 vs float64 np.interp in the
    # torch reference); for very large N this XLA sort dominates end-to-end.
    conf = conf_corr[0, :]
    xp = jnp.arange(N, dtype=jnp.float32)
    xq = jnp.linspace(0.0, float(N), n_bins + 1, dtype=jnp.float32)
    boundaries = jnp.interp(xq, xp, jnp.sort(conf))
    edges = jnp.stack([boundaries[:-1], boundaries[1:]], axis=1).astype(jnp.float32)  # (n_bins, 2)

    # Kernel-2 tile: decoupled from kernel 1, ~1 MiB blocks of the 8 B/sample input.
    tn2 = 131072
    if N <= tn2:
        tn2 = N
    grid2 = pl.cdiv(N, tn2)

    ece = pl.pallas_call(
        _make_ece_kernel(N, tn2, _CHUNK),
        out_shape=jax.ShapeDtypeStruct((1, 1), jnp.float32),
        grid=(grid2,),
        in_specs=[pl.BlockSpec((2, tn2), lambda i: (0, i)),
                  pl.BlockSpec((n_bins, 2), lambda i: (0, 0))],
        out_specs=pl.BlockSpec((1, 1), lambda i: (0, 0)),
        # float32 accumulators: counts exact up to 2^24 samples.
        scratch_shapes=[pltpu.VMEM((n_bins, _CHUNK), jnp.float32)] * 3,
        # TODO(synk): the single 'arbitrary' axis keeps kernel 2 on one TensorCore on
        # v7x; it is a small fraction of total traffic, so left single-core.
        compiler_params=pltpu.CompilerParams(
            dimension_semantics=("arbitrary",)),
    )(conf_corr, edges)

    return ece.reshape(1)


if __name__ == "__main__":
    key = jax.random.PRNGKey(0)
    k1, k2 = jax.random.split(key)
    N, C = 700, 10            # small; exercises full-chunk + remainder paths in kernel 2
    logits = jax.random.normal(k1, (N, C), dtype=jnp.float32) * 3.0
    labels = jax.random.randint(k2, (N,), 0, C, dtype=jnp.int32)

    ece = adaptive_ece(logits, labels)
    jax.block_until_ready(ece)

    # Pure-JAX reference replicating the torch module's math (float32).
    sm = jax.nn.softmax(logits, axis=1)
    conf_r = jnp.max(sm, axis=1)
    pred_r = jnp.argmax(sm, axis=1)
    acc_r = (pred_r == labels).astype(jnp.float32)
    bnd = jnp.interp(jnp.linspace(0.0, float(N), N_BINS + 1, dtype=jnp.float32),
                     jnp.arange(N, dtype=jnp.float32), jnp.sort(conf_r))
    ece_r = jnp.float32(0.0)
    for b in range(N_BINS):
        in_bin = jnp.logical_and(conf_r > bnd[b], conf_r <= bnd[b + 1]).astype(jnp.float32)
        cnt = jnp.sum(in_bin)
        prop = cnt / N
        safe = jnp.maximum(cnt, 1.0)
        gap = jnp.abs(jnp.sum(conf_r * in_bin) / safe - jnp.sum(acc_r * in_bin) / safe)
        ece_r = ece_r + jnp.where(cnt > 0, gap * prop, 0.0)

    assert abs(float(ece[0]) - float(ece_r)) < 5e-3, (float(ece[0]), float(ece_r))
    print("KERNEL_OK")
</pallas_src>

<mosaic_0001>
module attributes {stable_mosaic.version = 11 : i64} {
  func.func @_conf_acc_kernel(%arg0: i32, %arg1: memref<10x700xf32, #tpu.memory_space<vmem>>, %arg2: memref<1x700xi32, #tpu.memory_space<vmem>>, %arg3: memref<2x700xf32, #tpu.memory_space<vmem>>) attributes {dimension_semantics = [#tpu.dimension_semantics<parallel>], iteration_bounds = array<i64: 1>, scalar_prefetch = 0 : i64, scratch_operands = 0 : i64, tpu.core_type = #tpu.core_type<tc>, window_params = [{transform_indices = @transform_0, window_bounds = array<i64: 10, 700>}, {transform_indices = @transform_1, window_bounds = array<i64: 1, 700>}, {transform_indices = @transform_2, window_bounds = array<i64: 2, 700>}]} {
    %c0 = arith.constant 0 : index
    %c0_0 = arith.constant 0 : index
    %0 = vector.load %arg1[%c0, %c0_0] : memref<10x700xf32, #tpu.memory_space<vmem>>, vector<10x700xf32>
    %cst = arith.constant dense<0xFF800000> : vector<700xf32>
    %1 = vector.multi_reduction <maximumf>, %0, %cst [0] : vector<10x700xf32> to vector<700xf32>
    %2 = vector.shape_cast %1 : vector<700xf32> to vector<1x700xf32>
    %3 = tpu.iota {dimensions = array<i32: 0>} : vector<10x700xi32>
    %4 = arith.sitofp %3 : vector<10x700xi32> to vector<10x700xf32>
    %5 = vector.broadcast %2 : vector<1x700xf32> to vector<10x700xf32>
    %6 = arith.cmpf oeq, %0, %5 : vector<10x700xf32>
    %cst_1 = arith.constant 1.000000e+01 : f32
    %7 = vector.broadcast %cst_1 : f32 to vector<10x700xf32>
    %8 = arith.select %6, %4, %7 : vector<10x700xi1>, vector<10x700xf32>
    %cst_2 = arith.constant dense<0x7F800000> : vector<700xf32>
    %9 = vector.multi_reduction <minimumf>, %8, %cst_2 [0] : vector<10x700xf32> to vector<700xf32>
    %10 = vector.shape_cast %9 : vector<700xf32> to vector<1x700xf32>
    %11 = vector.broadcast %2 : vector<1x700xf32> to vector<10x700xf32>
    %12 = arith.subf %0, %11 : vector<10x700xf32>
    %13 = math.exp %12 : vector<10x700xf32>
    %cst_3 = arith.constant dense<0.000000e+00> : vector<700xf32>
    %14 = vector.multi_reduction <add>, %13, %cst_3 [0] : vector<10x700xf32> to vector<700xf32>
    %15 = vector.shape_cast %14 : vector<700xf32> to vector<1x700xf32>
    %cst_4 = arith.constant 1.000000e+00 : f32
    %16 = vector.broadcast %cst_4 : f32 to vector<1x700xf32>
    %17 = arith.divf %16, %15 : vector<1x700xf32>
    %c0_5 = arith.constant 0 : index
    %c0_6 = arith.constant 0 : index
    %18 = vector.load %arg2[%c0_5, %c0_6] : memref<1x700xi32, #tpu.memory_space<vmem>>, vector<1x700xi32>
    %19 = arith.sitofp %18 : vector<1x700xi32> to vector<1x700xf32>
    %20 = arith.cmpf oeq, %10, %19 : vector<1x700xf32>
    %21 = arith.extui %20 : vector<1x700xi1> to vector<1x700xi32>
    %22 = arith.sitofp %21 : vector<1x700xi32> to vector<1x700xf32>
    %c0_7 = arith.constant 0 : index
    %c0_8 = arith.constant 0 : index
    %23 = vector.load %arg3[%c0_7, %c0_8] : memref<2x700xf32, #tpu.memory_space<vmem>>, vector<1x700xf32>
    tpu.vector_store %arg3[%c0_7, %c0_8], %17 {strides = array<i32>} : memref<2x700xf32, #tpu.memory_space<vmem>>, vector<1x700xf32>,
    %c1 = arith.constant 1 : index
    %c0_9 = arith.constant 0 : index
    %24 = vector.load %arg3[%c1, %c0_9] : memref<2x700xf32, #tpu.memory_space<vmem>>, vector<1x700xf32>
    tpu.vector_store %arg3[%c1, %c0_9], %22 {strides = array<i32>} : memref<2x700xf32, #tpu.memory_space<vmem>>, vector<1x700xf32>,
    return
  }
  func.func @transform_0(%arg0: i32) -> (i32, i32) {
    %c0_i32 = arith.constant 0 : i32
    %c0_i32_0 = arith.constant 0 : i32
    return %c0_i32, %arg0 : i32, i32
  }
  func.func @transform_1(%arg0: i32) -> (i32, i32) {
    %c0_i32 = arith.constant 0 : i32
    %c0_i32_0 = arith.constant 0 : i32
    return %c0_i32, %arg0 : i32, i32
  }
  func.func @transform_2(%arg0: i32) -> (i32, i32) {
    %c0_i32 = arith.constant 0 : i32
    %c0_i32_0 = arith.constant 0 : i32
    return %c0_i32, %arg0 : i32, i32
  }
}

</mosaic_0001>

<bundles_post_ra>
// kernel: tpu_custom_call.1
= control target key start
LH: loop header
LB: loop body
LE: loop exit
PB: predicated region body
PF: predicated region fallthrough
CT: control target
= control target key end

     0   :  { %7 = vsyncpa [#allocation3], 0  ;;  %s777_s0 = inlined_call_operand.hbm [shape: f32[10,700], index: 0, kind: input, shape index: {}]   ;;  %s778_s1 = inlined_call_operand.hbm [shape: s32[1,700], index: 1, kind: input, shape index: {}]   ;;  %s779_s2 = inlined_call_operand.hbm [shape: f32[2,700], index: 2, kind: output, shape index: {}]  }
   0x1   :  { %8 = vsyncpa [#allocation6], 0 }
   0x2   :  { %9 = vsyncpa [#allocation4], 0  ;;  %s560_s9 = smov [#allocation2]  }
   0x3   :  { %s15_s10 = sshll.u32 %s560_s9, 4  ;;  %s16_s10 = int_to_ptr.vmem [resolvable:$true] %s15_s10 }
   0x4   :  { %s502_s11 = scalar_lea.vmem %s16_s10, 1536  ;;  %p507_p1 = scmp.lt.s32.totalorder %s16_s10, %s16_s10 }
   0x5   :  { %p503_p0 = scmp.ne.s32.totalorder %s16_s10, %s502_s11  ;;  %p508_p2 = scmp.lt.s32.totalorder %s502_s11, %s502_s11 }
   0x7   :  { %p509_p3 = por %p508_p2, %p507_p1 }
   0x9   :  { %p510_p4 = pnand %p509_p3, %p503_p0 }
   0xb   :  { %513 = shalt.err (!%p510_p4)
}
   0xc   :  { %s561_s12 = smov 768   ;;  %s562_s13 = smov 48  }
   0xd   :  { %21 = dma.hbm_to_vmem [thread:$0]  %s777_s0, 1536, %s16_s10, [#allocation3], %s561_s12, %s561_s12, %s562_s13  }
   0xe   :  { %s563_s16 = smov [#allocation5]  }
   0xf   :  { %s28_s17 = sshll.u32 %s563_s16, 4  ;;  %s29_s17 = int_to_ptr.vmem [resolvable:$true] %s28_s17 }
  0x10   :  { %s522_s18 = scalar_lea.vmem %s29_s17, 96  ;;  %p527_p6 = scmp.lt.s32.totalorder %s29_s17, %s29_s17 }
  0x11   :  { %p523_p5 = scmp.ne.s32.totalorder %s29_s17, %s522_s18  ;;  %p528_p7 = scmp.lt.s32.totalorder %s522_s18, %s522_s18 }
  0x13   :  { %p529_p8 = por %p528_p7, %p527_p6 }
  0x15   :  { %p530_p9 = pnand %p529_p8, %p523_p5 }
  0x17   :  { %533 = shalt.err (!%p530_p9)
}
  0x18   :  { %31 = dma.hbm_to_vmem [thread:$0]  %s778_s1, 96, %s29_s17, [#allocation6]  }
  0x19   :  { %554 = dma.done.wait [#allocation3], 1536  }
  0x1a   :  { %555 = vsyncadd [#allocation3], 4294965760 }
  0x1b   :  { %556 = dma.done.wait [#allocation6], 96  }
  0x1c   :  { %557 = vsyncadd [#allocation6], 4294967200  ;;  %v102_v0 = vlaneseq  ;;  %vm50_vm0 = vcmask 1041408   ;;  %vm91_vm1 = vcmask 490496   ;;  %v591_v2 = vld [vmem:[#allocation2] sm:$0xff]  ;;  %v593_v3 = vld [vmem:[#allocation2 + $0x8] sm:$0xff] }
  0x1d   :  { %vm93_vm2 = vcmask 484352   ;;  %v595_v4 = vld [vmem:[#allocation2 + $0x10] sm:$0xff]  ;;  %v597_v5 = vld [vmem:[#allocation2 + $0x18] sm:$0xff]  ;;  %v599_v6 = vld [vmem:[#allocation2 + $0x28] sm:$0xff]  ;;  %v564_v17 = vmov 1966171168  }
  0x1e   :  { %v589_v1 = vshrl.u32 %v102_v0, 7  ;;  %v604_v10 = vld [vmem:[#allocation2 + $0x30] sm:$0x3]  ;;  %v606_v11 = vld [vmem:[#allocation2 + $0x38] sm:$0x3]  ;;  %v338_v18 = vunpack.c.l.s4 %v564_v17  ;;  %v627_v23 = vld [vmem:[#allocation2 + $0x20] sm:$0xff] }
  0x1f   :  { %v608_v12 = vld [vmem:[#allocation2 + $0x40] sm:$0x3]  ;;  %v610_v13 = vld [vmem:[#allocation2 + $0x48] sm:$0x3]  ;;  %v612_v14 = vld [vmem:[#allocation2 + $0x50] sm:$0x3] }
  0x20   :  { %v104_v7 = vadd.s32 8, %v589_v1  ;;  %v282_v8 = vsub.s32 0, %v589_v1  ;;  %v286_v9 = vsub.s32 1, %v589_v1  ;;  %v614_v15 = vld [vmem:[#allocation2 + $0x58] sm:$0x3]  ;;  %v617_v16 = vcvt.s32.f32 %v589_v1  ;;  %s566_s0 = smov [#allocation7]  }
  0x21   :  { %v51_v19 = vsel %vm50_vm0, %v604_v10, -inf  ;;  %v59_v20 = vsel %vm50_vm0, %v606_v11, -inf  ;;  %v67_v21 = vsel %vm50_vm0, %v608_v12, -inf  ;;  %v75_v22 = vsel %vm50_vm0, %v610_v13, -inf  ;;  %v277_v36 = vld [vmem:[#allocation5] sm:$0x3f] }
  0x22   :  { %v52_v24 = vmax.f32 %v591_v2, %v51_v19  ;;  %v60_v25 = vmax.f32 %v593_v3, %v59_v20  ;;  %v68_v26 = vmax.f32 %v595_v4, %v67_v21  ;;  %v76_v27 = vmax.f32 %v597_v5, %v75_v22  ;;  %s435_s1 = sshll.u32 %s566_s0, 4  ;;  %s436_s1 = int_to_ptr.vmem [resolvable:$true] %s435_s1 }
  0x23   :  { %v83_v28 = vsel %vm50_vm0, %v612_v14, -inf  ;;  %v92_v29 = vsel %vm91_vm1, %v599_v6, -inf  ;;  %v94_v30 = vsel %vm93_vm2, %v614_v15, -inf  ;;  %v290_v31 = vsub.s32 2, %v589_v1  ;;  %s534_s21 = scalar_lea.vmem %s436_s1, 192  ;;  %p539_p11 = scmp.lt.s32.totalorder %s436_s1, %s436_s1 }
  0x24   :  { %v53_v32 = vrot.slane %v52_v24, 4  ;;  %v61_v33 = vrot.slane %v60_v25, 4  ;;  %v69_v34 = vrot.slane %v68_v26, 4  ;;  %v77_v35 = vrot.slane %v76_v27, 4  ;;  %p535_p10 = scmp.ne.s32.totalorder %s436_s1, %s534_s21  ;;  %p540_p12 = scmp.lt.s32.totalorder %s534_s21, %s534_s21 }
  0x25   :  { %v84_v37 = vmax.f32 %v627_v23, %v83_v28  ;;  %v95_v38 = vmax.f32 %v92_v29, %v94_v30  ;;  %v294_v39 = vsub.s32 3, %v589_v1  ;;  %v298_v40 = vsub.s32 4, %v589_v1 }
  0x26   :  { %v54_v41 = vmax.f32 %v52_v24, %v53_v32  ;;  %v62_v42 = vmax.f32 %v60_v25, %v61_v33  ;;  %v70_v43 = vmax.f32 %v68_v26, %v69_v34  ;;  %v78_v44 = vmax.f32 %v76_v27, %v77_v35  ;;  %p541_p13 = por %p540_p12, %p539_p11 }
  0x27   :  { %v85_v45 = vrot.slane %v84_v37, 4  ;;  %v96_v46 = vrot.slane %v95_v38, 4  ;;  %v643_v47 = vcvt.s32.f32 %v277_v36  ;;  %v339_v48 = vunpack.c.0.s8 %v338_v18 }
  0x28   :  { %v55_v49 = vrot.slane %v54_v41, 2  ;;  %v63_v50 = vrot.slane %v62_v42, 2  ;;  %v71_v51 = vrot.slane %v70_v43, 2  ;;  %v79_v52 = vrot.slane %v78_v44, 2  ;;  %p542_p0 = pnand %p541_p13, %p535_p10 }
  0x29   :  { %v86_v53 = vmax.f32 %v84_v37, %v85_v45  ;;  %v97_v54 = vmax.f32 %v95_v38, %v96_v46  ;;  %v106_v55 = vcvt.s32.f32 %v104_v7  ;;  %v302_v56 = vsub.s32 5, %v589_v1 }
  0x2a   :  { %v56_v57 = vmax.f32 %v54_v41, %v55_v49  ;;  %v64_v58 = vmax.f32 %v62_v42, %v63_v50  ;;  %v72_v59 = vmax.f32 %v70_v43, %v71_v51  ;;  %v80_v60 = vmax.f32 %v78_v44, %v79_v52 }
  0x2b   :  { %v87_v61 = vrot.slane %v86_v53, 2  ;;  %v98_v62 = vrot.slane %v97_v54, 2  ;;  %v647_v63 = vrot.slane %v643_v47, %v282_v8  ;;  %v650_v17 = vsub.s32 %v339_v48, %v589_v1 }
  0x2c   :  { %v57_v18 = vrot.slane %v56_v57, 1  ;;  %v65_v19 = vrot.slane %v64_v58, 1  ;;  %v73_v20 = vrot.slane %v72_v59, 1  ;;  %v81_v21 = vrot.slane %v80_v60, 1 }
  0x2d   :  { %v88_v22 = vmax.f32 %v86_v53, %v87_v61  ;;  %v99_v7 = vmax.f32 %v97_v54, %v98_v62  ;;  %v653_v24 = vrot.slane %v643_v47, %v286_v9  ;;  %v656_v25 = vrot.slane %v643_v47, %v290_v31 }
  0x2e   :  { %v658_v26 = vmax.f32 %v56_v57, %v57_v18  ;;  %v660_v27 = vmax.f32 %v64_v58, %v65_v19  ;;  %v662_v8 = vmax.f32 %v72_v59, %v73_v20  ;;  %v664_v28 = vmax.f32 %v80_v60, %v81_v21 }
  0x2f   :  { %v89_v29 = vrot.slane %v88_v22, 1  ;;  %v100_v30 = vrot.slane %v99_v7, 1  ;;  %v667_v32 = vrot.slane %v643_v47, %v294_v39  ;;  %v670_v33 = vrot.slane %v643_v47, %v298_v40 }
  0x30   :  { %vm107_vm3 = vcmp.eq.f32.partialorder %v591_v2, %v658_v26  ;;  %vm108_vm4 = vcmp.eq.f32.partialorder %v593_v3, %v660_v27  ;;  %vm109_vm5 = vcmp.eq.f32.partialorder %v595_v4, %v662_v8  ;;  %vm110_vm6 = vcmp.eq.f32.partialorder %v597_v5, %v664_v28 }
  0x31   :  { %v680_v9 = vmax.f32 %v88_v22, %v89_v29  ;;  %v682_v31 = vmax.f32 %v99_v7, %v100_v30  ;;  %vm113_vm7 = vcmp.eq.f32.partialorder %v604_v10, %v658_v26  ;;  %vm114_vm8 = vcmp.eq.f32.partialorder %v606_v11, %v660_v27 }
  0x32   :  { %vm115_vm9 = vcmp.eq.f32.partialorder %v608_v12, %v662_v8  ;;  %vm116_vm10 = vcmp.eq.f32.partialorder %v610_v13, %v664_v28  ;;  %v119_v34 = vsel %vm107_vm3, %v617_v16, 10.0  ;;  %v120_v35 = vsel %vm108_vm4, %v617_v16, 10.0 }
  0x33   :  { %vm111_vm11 = vcmp.eq.f32.partialorder %v627_v23, %v680_v9  ;;  %vm112_vm12 = vcmp.eq.f32.partialorder %v599_v6, %v682_v31  ;;  %vm117_vm13 = vcmp.eq.f32.partialorder %v612_v14, %v680_v9  ;;  %vm118_vm14 = vcmp.eq.f32.partialorder %v614_v15, %v682_v31 }
  0x34   :  { %v121_v36 = vsel %vm109_vm5, %v617_v16, 10.0  ;;  %v122_v37 = vsel %vm110_vm6, %v617_v16, 10.0  ;;  %v123_v38 = vsel %vm111_vm11, %v617_v16, 10.0  ;;  %v124_v39 = vsel %vm112_vm12, %v617_v16, 10.0 }
  0x35   :  { %v125_v40 = vsel %vm113_vm7, %v106_v55, 10.0  ;;  %v126_v41 = vsel %vm114_vm8, %v106_v55, 10.0  ;;  %v127_v42 = vsel %vm115_vm9, %v106_v55, 10.0  ;;  %v128_v43 = vsel %vm116_vm10, %v106_v55, 10.0 }
  0x36   :  { %v129_v44 = vsel %vm117_vm13, %v106_v55, 10.0  ;;  %v130_v45 = vsel %vm118_vm14, %v106_v55, 10.0  ;;  %v131_v46 = vsel %vm50_vm0, %v125_v40, inf  ;;  %v139_v48 = vsel %vm50_vm0, %v126_v41, inf }
  0x37   :  { %v132_v49 = vmin.f32 %v119_v34, %v131_v46  ;;  %v140_v50 = vmin.f32 %v120_v35, %v139_v48  ;;  %v147_v51 = vsel %vm50_vm0, %v127_v42, inf  ;;  %v155_v52 = vsel %vm50_vm0, %v128_v43, inf }
  0x38   :  { %v148_v53 = vmin.f32 %v121_v36, %v147_v51  ;;  %v156_v54 = vmin.f32 %v122_v37, %v155_v52  ;;  %v163_v16 = vsel %vm50_vm0, %v129_v44, inf  ;;  %v171_v57 = vsel %vm91_vm1, %v124_v39, inf }
  0x39   :  { %v133_v58 = vrot.slane %v132_v49, 4  ;;  %v141_v59 = vrot.slane %v140_v50, 4  ;;  %v164_v60 = vmin.f32 %v123_v38, %v163_v16  ;;  %v172_v55 = vsel %vm93_vm2, %v130_v45, inf }
  0x3a   :  { %v149_v61 = vrot.slane %v148_v53, 4  ;;  %v157_v62 = vrot.slane %v156_v54, 4  ;;  %v173_v18 = vmin.f32 %v171_v57, %v172_v55  ;;  %v716_v19 = vrot.slane %v643_v47, %v302_v56 }
  0x3b   :  { %v134_v20 = vmin.f32 %v132_v49, %v133_v58  ;;  %v142_v21 = vmin.f32 %v140_v50, %v141_v59  ;;  %v165_v22 = vrot.slane %v164_v60, 4  ;;  %v180_v7 = vsub.f32 %v591_v2, %v658_v26 }
  0x3c   :  { %v150_v29 = vmin.f32 %v148_v53, %v149_v61  ;;  %v158_v30 = vmin.f32 %v156_v54, %v157_v62  ;;  %v174_v34 = vrot.slane %v173_v18, 4  ;;  %v181_v35 = vsub.f32 %v593_v3, %v660_v27 }
  0x3d   :  { %v135_v36 = vrot.slane %v134_v20, 2  ;;  %v143_v37 = vrot.slane %v142_v21, 2  ;;  %v166_v38 = vmin.f32 %v164_v60, %v165_v22  ;;  %v182_v1 = vsub.f32 %v595_v4, %v662_v8 }
  0x3e   :  { %v151_v47 = vrot.slane %v150_v29, 2  ;;  %v159_v56 = vrot.slane %v158_v30, 2  ;;  %v175_v39 = vmin.f32 %v173_v18, %v174_v34  ;;  %v183_v40 = vsub.f32 %v597_v5, %v664_v28 }
  0x3f   :  { %v136_v41 = vmin.f32 %v134_v20, %v135_v36  ;;  %v144_v2 = vmin.f32 %v142_v21, %v143_v37  ;;  %v167_v42 = vrot.slane %v166_v38, 2  ;;  %v184_v43 = vsub.f32 %v627_v23, %v680_v9 }
  0x40   :  { %v152_v44 = vmin.f32 %v150_v29, %v151_v47  ;;  %v160_v3 = vmin.f32 %v158_v30, %v159_v56  ;;  %v176_v45 = vrot.slane %v175_v39, 2  ;;  %v185_v46 = vsub.f32 %v599_v6, %v682_v31 }
  0x41   :  { %v137_v48 = vrot.slane %v136_v41, 1  ;;  %v145_v4 = vrot.slane %v144_v2, 1  ;;  %v168_v49 = vmin.f32 %v166_v38, %v167_v42  ;;  %v186_v50 = vsub.f32 %v604_v10, %v658_v26 }
  0x42   :  { %v153_v51 = vrot.slane %v152_v44, 1  ;;  %v161_v5 = vrot.slane %v160_v3, 1  ;;  %v177_v52 = vmin.f32 %v175_v39, %v176_v45  ;;  %v187_v53 = vsub.f32 %v606_v11, %v660_v27 }
  0x43   :  { %v138_v54 = vmin.f32 %v136_v41, %v137_v48  ;;  %v146_v23 = vmin.f32 %v144_v2, %v145_v4  ;;  %v169_v16 = vrot.slane %v168_v49, 1  ;;  %v188_v57 = vsub.f32 %v608_v12, %v662_v8 }
  0x44   :  { %v154_v58 = vmin.f32 %v152_v44, %v153_v51  ;;  %v162_v6 = vmin.f32 %v160_v3, %v161_v5  ;;  %v178_v59 = vrot.slane %v177_v52, 1  ;;  %v189_v60 = vsub.f32 %v610_v13, %v664_v28 }
  0x45   :  { %v170_v55 = vmin.f32 %v168_v49, %v169_v16  ;;  %v190_v10 = vsub.f32 %v612_v14, %v680_v9  ;;  %v192_v26 = vmul.f32 1.442695, %v180_v7  ;;  %v194_v61 = vmul.f32 1.442695, %v181_v35 }
  0x46   :  { %v179_v62 = vmin.f32 %v177_v52, %v178_v59  ;;  %v191_v11 = vsub.f32 %v614_v15, %v682_v31  ;;  %v196_v27 = vmul.f32 1.442695, %v182_v1  ;;  %v198_v18 = vmul.f32 1.442695, %v183_v40 }
  0x47   :  { %458 = vpow2.f32 %v192_v26  ;;  %v200_v12 = vmul.f32 1.442695, %v184_v43  ;;  %v202_v8 = vmul.f32 1.442695, %v185_v46  ;;  %v204_v20 = vmul.f32 1.442695, %v186_v50 }
  0x48   :  { %460 = vpow2.f32 %v194_v61  ;;  %v206_v21 = vmul.f32 1.442695, %v187_v53  ;;  %v208_v22 = vmul.f32 1.442695, %v188_v57  ;;  %v210_v13 = vmul.f32 1.442695, %v189_v60 }
  0x49   :  { %462 = vpow2.f32 %v196_v27  ;;  %v212_v28 = vmul.f32 1.442695, %v190_v10  ;;  %vm310_vm15 = vcmp.eq.f32.partialorder %v138_v54, %v647_v63  ;;  %vm311_vm3 = vcmp.eq.f32.partialorder %v146_v23, %v653_v24 }
  0x4a   :  { %464 = vpow2.f32 %v198_v18  ;;  %vm312_vm4 = vcmp.eq.f32.partialorder %v154_v58, %v656_v25  ;;  %vm313_vm5 = vcmp.eq.f32.partialorder %v162_v6, %v667_v32  ;;  %vm314_vm6 = vcmp.eq.f32.partialorder %v170_v55, %v670_v33 }
  0x4b   :  { %466 = vpow2.f32 %v200_v12  ;;  %vm315_vm7 = vcmp.eq.f32.partialorder %v179_v62, %v716_v19  ;;  %v565_v14 = vmov 0.0   ;;  %v214_v25 = vmul.f32 1.442695, %v191_v11 }
  0x4c   :  { %v445_v15 = vsel %vm310_vm15, 1.0, %v565_v14  ;;  %v446_v9 = vsel %vm311_vm3, 1.0, %v565_v14  ;;  %468 = vpow2.f32 %v202_v8  ;;  %v447_v31 = vsel %vm312_vm4, 1.0, %v565_v14 }
  0x4d   :  { %v448_v7 = vsel %vm313_vm5, 1.0, %v565_v14  ;;  %v449_v29 = vsel %vm314_vm6, 1.0, %v565_v14  ;;  %470 = vpow2.f32 %v204_v20  ;;  %v450_v63 = vsel %vm315_vm7, 1.0, %v565_v14 }
  0x4e   :  { %v386_v24 = vcombine.low %v445_v15, %v446_v9  ;;  %v387_v30 = vcombine.low %v447_v31, %v448_v7  ;;  %472 = vpow2.f32 %v206_v21  ;;  %v388_v34 = vcombine.low %v449_v29, %v450_v63 }
  0x4f   :  { %474 = vpow2.f32 %v208_v22  ;;  %vm754_vm8 = vcmp.lt.s32.totalorder %v102_v0, 700 }
  0x50   :  { %v395_v32 = vrot.slane %v386_v24, %v650_v17  ;;  %v402_v33 = vrot.slane %v387_v30, %v650_v17  ;;  %476 = vpow2.f32 %v210_v13  ;;  %v409_v19 = vrot.slane %v388_v34, %v650_v17 }
  0x51   :  { %478 = vpow2.f32 %v212_v28 }
  0x52   :  { %v410_v35 = vcombine.low %v395_v32, %v402_v33  ;;  %480 = vpow2.f32 %v214_v25  ;;  %v424_v36 = vrot.slane %v409_v19, %v650_v17 }
  0x54   :  { %v417_v37 = vrot.slane %v410_v35, %v650_v17  ;;  %v459_v38 = vpop.eup %458 }
  0x55   :  { %v461_v47 = vpop.eup %460 }
  0x56   :  { %v425_v56 = vcombine.low %v417_v37, %v424_v36  ;;  %v463_v39 = vpop.eup %462 }
  0x57   :  { %v465_v40 = vpop.eup %464 }
  0x58   :  { %428 = vst.msk [vmem:[#allocation7 + $0x1] ss:$2 sm:$0x3f] %vm754_vm8, %v425_v56  ;;  %v467_v41 = vpop.eup %466 }
  0x59   :  { %v469_v2 = vpop.eup %468 }
  0x5a   :  { %v471_v42 = vpop.eup %470  ;;  %v256_v52 = vsel %vm91_vm1, %v469_v2, 0.0 }
  0x5b   :  { %v473_v43 = vpop.eup %472  ;;  %v216_v44 = vsel %vm50_vm0, %v471_v42, 0.0 }
  0x5c   :  { %v475_v3 = vpop.eup %474  ;;  %v217_v45 = vadd.f32 %v459_v38, %v216_v44  ;;  %v224_v0 = vsel %vm50_vm0, %v473_v43, 0.0 }
  0x5d   :  { %v477_v46 = vpop.eup %476  ;;  %v225_v48 = vadd.f32 %v461_v47, %v224_v0  ;;  %v232_v4 = vsel %vm50_vm0, %v475_v3, 0.0 }
  0x5e   :  { %v479_v49 = vpop.eup %478  ;;  %v218_v50 = vrot.slane %v217_v45, 4  ;;  %v233_v51 = vadd.f32 %v463_v39, %v232_v4  ;;  %v240_v5 = vsel %vm50_vm0, %v477_v46, 0.0 }
  0x5f   :  { %v481_v53 = vpop.eup %480  ;;  %v226_v54 = vrot.slane %v225_v48, 4  ;;  %v241_v23 = vadd.f32 %v465_v40, %v240_v5  ;;  %v248_v16 = vsel %vm50_vm0, %v479_v49, 0.0 }
  0x60   :  { %v219_v57 = vadd.f32 %v218_v50, %v217_v45  ;;  %v234_v58 = vrot.slane %v233_v51, 4  ;;  %v249_v6 = vadd.f32 %v467_v41, %v248_v16  ;;  %v257_v59 = vsel %vm93_vm2, %v481_v53, 0.0 }
  0x61   :  { %v227_v60 = vadd.f32 %v226_v54, %v225_v48  ;;  %v242_v55 = vrot.slane %v241_v23, 4  ;;  %v258_v10 = vadd.f32 %v257_v59, %v256_v52 }
  0x62   :  { %v220_v26 = vrot.slane %v219_v57, 2  ;;  %v235_v61 = vadd.f32 %v234_v58, %v233_v51  ;;  %v250_v62 = vrot.slane %v249_v6, 4 }
  0x63   :  { %v228_v11 = vrot.slane %v227_v60, 2  ;;  %v243_v27 = vadd.f32 %v242_v55, %v241_v23  ;;  %v259_v18 = vrot.slane %v258_v10, 4 }
  0x64   :  { %v221_v12 = vadd.f32 %v220_v26, %v219_v57  ;;  %v236_v8 = vrot.slane %v235_v61, 2  ;;  %v251_v20 = vadd.f32 %v250_v62, %v249_v6 }
  0x65   :  { %v229_v21 = vadd.f32 %v228_v11, %v227_v60  ;;  %v244_v22 = vrot.slane %v243_v27, 2  ;;  %v260_v13 = vadd.f32 %v259_v18, %v258_v10 }
  0x66   :  { %v222_v28 = vrot.slane %v221_v12, 1  ;;  %v237_v14 = vadd.f32 %v236_v8, %v235_v61  ;;  %v252_v15 = vrot.slane %v251_v20, 2 }
  0x67   :  { %v230_v9 = vrot.slane %v229_v21, 1  ;;  %v245_v31 = vadd.f32 %v244_v22, %v243_v27  ;;  %v261_v7 = vrot.slane %v260_v13, 2 }
  0x68   :  { %v223_v29 = vadd.f32 %v222_v28, %v221_v12  ;;  %v238_v63 = vrot.slane %v237_v14, 1  ;;  %v253_v24 = vadd.f32 %v252_v15, %v251_v20 }
  0x69   :  { %v231_v30 = vadd.f32 %v230_v9, %v229_v21  ;;  %v246_v25 = vrot.slane %v245_v31, 1  ;;  %v262_v34 = vadd.f32 %v261_v7, %v260_v13 }
  0x6a   :  { %v239_v32 = vadd.f32 %v238_v63, %v237_v14  ;;  %v254_v33 = vrot.slane %v253_v24, 1  ;;  %482 = vrcp.f32 %v223_v29 }
  0x6b   :  { %v247_v19 = vadd.f32 %v246_v25, %v245_v31  ;;  %v263_v35 = vrot.slane %v262_v34, 1  ;;  %484 = vrcp.f32 %v231_v30 }
  0x6c   :  { %v255_v36 = vadd.f32 %v254_v33, %v253_v24  ;;  %486 = vrcp.f32 %v239_v32 }
  0x6d   :  { %v264_v37 = vadd.f32 %v263_v35, %v262_v34  ;;  %488 = vrcp.f32 %v247_v19 }
  0x6e   :  { %490 = vrcp.f32 %v255_v36 }
  0x6f   :  { %492 = vrcp.f32 %v264_v37 }
  0x77   :  { %v483_v38 = vpop.eup %482 }
  0x78   :  { %v485_v47 = vpop.eup %484 }
  0x79   :  { %v487_v56 = vpop.eup %486  ;;  %v334_v39 = vcombine.low %v483_v38, %v485_v47 }
  0x7a   :  { %v489_v40 = vpop.eup %488 }
  0x7b   :  { %v491_v41 = vpop.eup %490  ;;  %v335_v2 = vcombine.low %v487_v56, %v489_v40  ;;  %v343_v42 = vrot.slane %v334_v39, %v650_v17 }
  0x7c   :  { %v493_v43 = vpop.eup %492 }
  0x7d   :  { %v336_v44 = vcombine.low %v491_v41, %v493_v43  ;;  %v350_v3 = vrot.slane %v335_v2, %v650_v17 }
  0x7f   :  { %v357_v45 = vrot.slane %v336_v44, %v650_v17  ;;  %v358_v0 = vcombine.low %v343_v42, %v350_v3 }
  0x81   :  { %v365_v46 = vrot.slane %v358_v0, %v650_v17  ;;  %v372_v48 = vrot.slane %v357_v45, %v650_v17 }
  0x83   :  { %v373_v4 = vcombine.low %v365_v46, %v372_v48 }
  0x85   :  { %379 = vst.msk [vmem:[#allocation7] ss:$2 sm:$0x3f] %vm754_vm8, %v373_v4 }
  0x86   :  { %545 = shalt.err (!%p542_p0)
}
  0x87   :  { %438 = dma.vmem_to_hbm [thread:$0]  %s436_s1, 192, %s779_s2, [#allocation4]  }
  0x88   :  { %558 = dma.done.wait [#allocation4], 192  }
  0x89   :  { %559 = vsyncadd [#allocation4], 4294967104 }
  0x8a   :  { %442 = vsyncpa [#allocation3], 1 }
  0x8b   :  { %443 = vsyncpa [#allocation6], 1 }
  0x8c   :  { %444 = vsyncpa [#allocation4], 1 }

</bundles_post_ra>
